<compile_context>
chip_gen: v6e
topology: v6e:2x2x1
jax: 0.10.0
libtpu: 0.0.40
codegen_flags: <defaults>
</compile_context>

<pallas_src>
import functools

import jax
import jax.numpy as jnp
from jax.experimental import pallas as pl
from jax.experimental.pallas import tpu as pltpu


def _round_up(a, m):
    return ((a + m - 1) // m) * m


def _vmem_capacity_bytes():
    try:
        return int(pltpu.get_tpu_info().vmem_capacity_bytes)
    except Exception:
        return 64 * 2**20          # conservative (v7x per-TensorCore VMEM)


def _choose_tile_nodes(n, d, v, h, vmem_capacity):
    """Largest multiple-of-128 node tile whose working set fits the VMEM budget."""
    n128 = _round_up(max(n, 1), 128)
    kp = _round_up(n128 + v, 128)
    # Residents (Y bf16, bias2 f32, W1^T f32, b1 f32); count x2 for pipeline buffers.
    resident = 2 * (2 * kp * d + 4 * d + 4 * d * h + 4 * h)
    budget = int(0.75 * vmem_capacity) - resident - (4 << 20)   # headroom for Mosaic scratch
    # Streamed bytes per node, double-buffered: bf16 B row + bf16 x row + bf16 hidden row.
    per_node = 2 * (2 * kp + 2 * d + 2 * d)
    tile = budget // per_node if (per_node > 0 and budget > 0) else 128
    tile = (int(tile) // 128) * 128
    return max(128, min(tile, n128))


def _gcn_kernel(b_ref, x_ref, y_ref, bias2_ref, w1_ref, b1_ref,
                hidden_ref, partial_ref, *, tile_nodes, n_valid):
    i = pl.program_id(0)

    # Fused (in + out neighbor + edge-embedding) aggregation with the `neighbors` Linear
    # already folded into Y:   [TN, KP](bf16) @ [KP, D](bf16) -> f32.
    agg = jnp.dot(b_ref[...], y_ref[...], preferred_element_type=jnp.float32)   # [TN, D]
    hidden = x_ref[...].astype(jnp.float32) + agg + bias2_ref[...]              # node + in + out
    hidden_ref[...] = hidden.astype(hidden_ref.dtype)                           # bf16 writeback

    # MLP readout, partially reduced per tile: relu(hidden @ W1^T + b1), summed over the
    # tile's valid nodes.  Tiny op — kept f32 so the softmax stays close to the reference.
    h1 = jnp.dot(hidden, w1_ref[...], preferred_element_type=jnp.float32) + b1_ref[...]
    h1 = jnp.maximum(h1, 0.0)                                                    # [TN, H]
    row = i * tile_nodes + jax.lax.broadcasted_iota(jnp.int32, (tile_nodes, 1), 0)
    h1 = jnp.where(row < n_valid, h1, 0.0)           # drop padded rows from the graph sum
    partial_ref[...] = jnp.sum(h1, axis=0, keepdims=True)[None]                  # [1, 1, H]


def gcn_conv_forward(node_reps, in_indices, in_edges, in_mask,
                     out_indices, out_edges, out_mask,
                     edge_emb, W_neighbors, b_neighbors, W1, b1, W2, b2,
                     *, tile_nodes=None):
    """Mirrors GCNConv.forward (batch size 1). Returns (node_hidden [1,N,D], readout [2])."""
    _, N, D = node_reps.shape
    V = edge_emb.shape[0]
    H = W1.shape[0]
    P = jax.lax.Precision.HIGHEST

    x = node_reps[0].astype(jnp.float32)             # [N, D]  (dropout: eval-mode identity)

    # ---- glue: data-dependent scatters (not expressible as a BlockSpec index_map) ----
    def scatter_counts(idx, msk, width):
        n, k = idx.shape
        r = jnp.broadcast_to(jnp.arange(n)[:, None], (n, k))
        return jnp.zeros((n, width), jnp.float32).at[r, idx].add(msk.astype(jnp.float32))

    A = (scatter_counts(in_indices[0], in_mask[0], N)
         + scatter_counts(out_indices[0], out_mask[0], N))        # [N, N] neighbor counts
    C = (scatter_counts(in_edges[0], in_mask[0], V)
         + scatter_counts(out_edges[0], out_mask[0], V))          # [N, V] edge counts

    # ---- parameter / input folds (one XLA matmul each) ----
    wn_node = W_neighbors[:, :D].T                                 # [D, D]
    wn_edge = W_neighbors[:, D:].T                                 # [D, D]
    y = jnp.dot(x, wn_node, precision=P)                           # [N, D]  = x @ Wn_node^T
    EW = jnp.dot(edge_emb.astype(jnp.float32), wn_edge, precision=P)   # [V, D]
    bias2 = (2.0 * b_neighbors).reshape(1, D).astype(jnp.float32)  # same Linear applied twice
    w1 = W1.T.astype(jnp.float32)                                  # [D, H]
    b1_ = b1.reshape(1, H).astype(jnp.float32)

    # ---- tiling over the node axis (per-generation VMEM budget) ----
    vmem_cap = _vmem_capacity_bytes()
    if tile_nodes is None:
        tile_nodes = _choose_tile_nodes(N, D, V, H, vmem_cap)
    tile_nodes = max(128, _round_up(tile_nodes, 128))
    tile_nodes = min(tile_nodes, _round_up(N, 128))
    N_pad = _round_up(N, tile_nodes)
    num_tiles = N_pad // tile_nodes
    KP = _round_up(N_pad + V, 128)                                 # fused contraction width

    # B = [A | C] padded to (N_pad, KP);  Y = [y ; EW] padded to (KP, D).  Padded rows of
    # y / EW are multiplied by zero columns of B, so padding with zeros is exact.
    B = jnp.zeros((N_pad, KP), jnp.float32)
    B = B.at[:N, :N].set(A)
    B = B.at[:N, N_pad:N_pad + V].set(C)
    Y = jnp.zeros((KP, D), jnp.float32)
    Y = Y.at[:N, :].set(y)
    Y = Y.at[N_pad:N_pad + V, :].set(EW)
    xp = jnp.zeros((N_pad, D), jnp.float32).at[:N, :].set(x)

    # bf16 streams/operands: A/C entries are small integer counts (exact in bf16); y/EW/x
    # casts are the standard bf16-operand, f32-accumulate MXU recipe.
    B = B.astype(jnp.bfloat16)
    Y = Y.astype(jnp.bfloat16)
    xp = xp.astype(jnp.bfloat16)

    # ---- explicit scoped-VMEM request (no double-counting of double-buffered streams) ----
    resident = 2 * (2 * KP * D + 4 * D + 4 * D * H + 4 * H)        # x2 pipeline buffers
    streams = 2 * tile_nodes * (2 * KP + 2 * D)                    # bf16 B + x, double-buffered
    outs = 2 * (tile_nodes * D * 2 + H * 4)                        # bf16 hidden + f32 partial
    vmem_limit = int(min(max(resident + streams + outs + (8 << 20), 16 << 20),
                         int(0.95 * vmem_cap)))

    kernel = functools.partial(_gcn_kernel, tile_nodes=tile_nodes, n_valid=N)

    hidden_pad, partials = pl.pallas_call(
        kernel,
        grid=(num_tiles,),
        in_specs=[
            pl.BlockSpec((tile_nodes, KP), lambda i: (i, 0)),      # B = [A|C]   (streamed, bf16)
            pl.BlockSpec((tile_nodes, D), lambda i: (i, 0)),       # x residual  (streamed, bf16)
            pl.BlockSpec((KP, D), lambda i: (0, 0)),               # Y = [x@Wn ; EW]  (resident)
            pl.BlockSpec((1, D), lambda i: (0, 0)),                # 2*b_neighbors
            pl.BlockSpec((D, H), lambda i: (0, 0)),                # W1^T
            pl.BlockSpec((1, H), lambda i: (0, 0)),                # b1
        ],
        out_specs=(
            pl.BlockSpec((tile_nodes, D), lambda i: (i, 0)),       # hidden (bf16, lane-dense)
            pl.BlockSpec((1, 1, H), lambda i: (i, 0, 0)),          # per-tile readout partial
        ),
        out_shape=(
            jax.ShapeDtypeStruct((N_pad, D), jnp.bfloat16),
            jax.ShapeDtypeStruct((num_tiles, 1, H), jnp.float32),
        ),
        compiler_params=pltpu.CompilerParams(
            dimension_semantics=("parallel",),
            vmem_limit_bytes=vmem_limit,
        ),
    )(B, xp, Y, bias2, w1, b1_)

    # NOTE: padded rows of hidden_pad contain bias2 (padded B/x rows are zero); they are
    # sliced off here and masked out of the readout sum inside the kernel.
    node_hidden = hidden_pad[:N].astype(jnp.float32)[None, :, :]   # [1, N, D]

    # Finish the readout (tiny): sum per-tile partials, one Linear on the summed h1
    # (exact since ReLU is per-node), then softmax.
    h1_sum = partials[:, 0, :].sum(axis=0)                         # [H]
    logits = jnp.dot(h1_sum, W2.T, precision=P) + N * b2           # [2]
    readout = jax.nn.softmax(logits)
    return node_hidden, readout


def gcn_conv_reference(node_reps, in_indices, in_edges, in_mask,
                       out_indices, out_edges, out_mask,
                       edge_emb, W_neighbors, b_neighbors, W1, b1, W2, b2):
    """Plain-JAX mirror of the PyTorch forward (f32, highest precision)."""
    P = jax.lax.Precision.HIGHEST
    x = node_reps[0]

    def agg(idx, edg, msk):
        nbr = x[idx[0]]                                            # [N, K, D]
        er = edge_emb[edg[0]]                                      # [N, K, D]
        reps = jnp.concatenate([nbr, er], axis=-1) * msk[0][..., None]
        return reps.sum(axis=1)                                    # [N, 2D]

    in_reps = agg(in_indices, in_edges, in_mask)
    out_reps = agg(out_indices, out_edges, out_mask)
    in_nodes = jnp.dot(in_reps, W_neighbors.T, precision=P) + b_neighbors
    out_nodes = jnp.dot(out_reps, W_neighbors.T, precision=P) + b_neighbors
    node_hidden = x + out_nodes + in_nodes                         # [N, D]
    h1 = jnp.maximum(jnp.dot(node_hidden, W1.T, precision=P) + b1, 0.0)
    logits = (jnp.dot(h1, W2.T, precision=P) + b2).sum(axis=0)     # [2]
    return node_hidden[None], jax.nn.softmax(logits)


if __name__ == "__main__":
    key = jax.random.PRNGKey(0)
    N, K, D = 72, 8, 128          # node_num, neighbor_num, embed_dim (D=128 -> lane-dense)
    EDGE_VOCAB = 8

    ks = jax.random.split(key, 14)
    node_reps = jax.random.normal(ks[0], (1, N, D), jnp.float32)
    in_indices = jax.random.randint(ks[1], (1, N, K), 0, N)
    in_edges = jax.random.randint(ks[2], (1, N, K), 0, EDGE_VOCAB)
    in_mask = (jax.random.uniform(ks[3], (1, N, K)) > 0.3).astype(jnp.float32)
    out_indices = jax.random.randint(ks[4], (1, N, K), 0, N)
    out_edges = jax.random.randint(ks[5], (1, N, K), 0, EDGE_VOCAB)
    out_mask = (jax.random.uniform(ks[6], (1, N, K)) > 0.3).astype(jnp.float32)

    # Deterministic parameters (shapes follow the PyTorch module's __init__).
    edge_emb = 0.1 * jax.random.normal(ks[7], (EDGE_VOCAB, D), jnp.float32)
    W_neighbors = 0.1 * jax.random.normal(ks[8], (D, 2 * D), jnp.float32)
    b_neighbors = 0.1 * jax.random.normal(ks[9], (D,), jnp.float32)
    W1 = 0.1 * jax.random.normal(ks[10], (D // 4, D), jnp.float32)
    b1 = 0.1 * jax.random.normal(ks[11], (D // 4,), jnp.float32)
    W2 = 0.1 * jax.random.normal(ks[12], (2, D // 4), jnp.float32)
    b2 = 0.1 * jax.random.normal(ks[13], (2,), jnp.float32)

    # tile_nodes is auto-sized from the detected VMEM capacity; for N=72 this collapses
    # to a single 128-row tile (1-step grid, full MXU M fill).
    node_hidden, readout = gcn_conv_forward(
        node_reps, in_indices, in_edges, in_mask,
        out_indices, out_edges, out_mask,
        edge_emb, W_neighbors, b_neighbors, W1, b1, W2, b2)
    jax.block_until_ready((node_hidden, readout))

    ref_hidden, ref_readout = gcn_conv_reference(
        node_reps, in_indices, in_edges, in_mask,
        out_indices, out_edges, out_mask,
        edge_emb, W_neighbors, b_neighbors, W1, b1, W2, b2)

    assert node_hidden.shape == (1, N, D)
    assert readout.shape == (2,)
    assert bool(jnp.allclose(node_hidden, ref_hidden, atol=5e-2, rtol=5e-2))
    assert bool(jnp.allclose(readout, ref_readout, atol=5e-2, rtol=5e-2))
    print("KERNEL_OK")
</pallas_src>

<mosaic_0001>
module attributes {stable_mosaic.version = 11 : i64} {
  func.func @_gcn_kernel(%arg0: i32, %arg1: memref<128x256xbf16, #tpu.memory_space<vmem>>, %arg2: memref<128x128xbf16, #tpu.memory_space<vmem>>, %arg3: memref<256x128xbf16, #tpu.memory_space<vmem>>, %arg4: memref<1x128xf32, #tpu.memory_space<vmem>>, %arg5: memref<128x32xf32, #tpu.memory_space<vmem>>, %arg6: memref<1x32xf32, #tpu.memory_space<vmem>>, %arg7: memref<128x128xbf16, #tpu.memory_space<vmem>>, %arg8: memref<1x1x32xf32, #tpu.memory_space<vmem>>) attributes {dimension_semantics = [#tpu.dimension_semantics<parallel>], iteration_bounds = array<i64: 1>, scalar_prefetch = 0 : i64, scratch_operands = 0 : i64, tpu.core_type = #tpu.core_type<tc>, window_params = [{transform_indices = @transform_0, window_bounds = array<i64: 128, 256>}, {transform_indices = @transform_1, window_bounds = array<i64: 128, 128>}, {pipeline_mode = #tpu.pipeline_mode<synchronous>, transform_indices = @transform_2, window_bounds = array<i64: 256, 128>}, {pipeline_mode = #tpu.pipeline_mode<synchronous>, transform_indices = @transform_3, window_bounds = array<i64: 1, 128>}, {pipeline_mode = #tpu.pipeline_mode<synchronous>, transform_indices = @transform_4, window_bounds = array<i64: 128, 32>}, {pipeline_mode = #tpu.pipeline_mode<synchronous>, transform_indices = @transform_5, window_bounds = array<i64: 1, 32>}, {transform_indices = @transform_6, window_bounds = array<i64: 128, 128>}, {transform_indices = @transform_7, window_bounds = array<i64: 1, 1, 32>}]} {
    %c0 = arith.constant 0 : index
    %c0_0 = arith.constant 0 : index
    %0 = vector.load %arg1[%c0, %c0_0] : memref<128x256xbf16, #tpu.memory_space<vmem>>, vector<128x256xbf16>
    %c0_1 = arith.constant 0 : index
    %c0_2 = arith.constant 0 : index
    %1 = vector.load %arg3[%c0_1, %c0_2] : memref<256x128xbf16, #tpu.memory_space<vmem>>, vector<256x128xbf16>
    %cst = arith.constant dense<0.000000e+00> : vector<128x128xf32>
    %2 = tpu.matmul %0, %1, %cst {dimension_numbers = #tpu.dot_dimension_numbers<[1], [0], [0], [1], [0, 0, 1, 1], [], []>} : vector<128x256xbf16>, vector<256x128xbf16>, vector<128x128xf32> -> vector<128x128xf32>
    %c0_3 = arith.constant 0 : index
    %c0_4 = arith.constant 0 : index
    %3 = vector.load %arg2[%c0_3, %c0_4] : memref<128x128xbf16, #tpu.memory_space<vmem>>, vector<128x128xbf16>
    %4 = arith.extf %3 : vector<128x128xbf16> to vector<128x128xf32>
    %5 = arith.addf %4, %2 : vector<128x128xf32>
    %c0_5 = arith.constant 0 : index
    %c0_6 = arith.constant 0 : index
    %6 = vector.load %arg4[%c0_5, %c0_6] : memref<1x128xf32, #tpu.memory_space<vmem>>, vector<1x128xf32>
    %7 = vector.broadcast %6 : vector<1x128xf32> to vector<128x128xf32>
    %8 = arith.addf %5, %7 : vector<128x128xf32>
    %9 = arith.truncf %8 : vector<128x128xf32> to vector<128x128xbf16>
    %c0_7 = arith.constant 0 : index
    %c0_8 = arith.constant 0 : index
    %10 = vector.load %arg7[%c0_7, %c0_8] : memref<128x128xbf16, #tpu.memory_space<vmem>>, vector<128x128xbf16>
    tpu.vector_store %arg7[%c0_7, %c0_8], %9 {strides = array<i32>} : memref<128x128xbf16, #tpu.memory_space<vmem>>, vector<128x128xbf16>,
    %c0_9 = arith.constant 0 : index
    %c0_10 = arith.constant 0 : index
    %11 = vector.load %arg5[%c0_9, %c0_10] : memref<128x32xf32, #tpu.memory_space<vmem>>, vector<128x32xf32>
    %cst_11 = arith.constant dense<0.000000e+00> : vector<128x32xf32>
    %12 = tpu.matmul %8, %11, %cst_11 {dimension_numbers = #tpu.dot_dimension_numbers<[1], [0], [0], [1], [0, 0, 1, 1], [], []>} : vector<128x128xf32>, vector<128x32xf32>, vector<128x32xf32> -> vector<128x32xf32>
    %c0_12 = arith.constant 0 : index
    %c0_13 = arith.constant 0 : index
    %13 = vector.load %arg6[%c0_12, %c0_13] : memref<1x32xf32, #tpu.memory_space<vmem>>, vector<1x32xf32>
    %14 = vector.broadcast %13 : vector<1x32xf32> to vector<128x32xf32>
    %15 = arith.addf %12, %14 : vector<128x32xf32>
    %cst_14 = arith.constant 0.000000e+00 : f32
    %16 = vector.broadcast %cst_14 : f32 to vector<128x32xf32>
    %17 = arith.maximumf %15, %16 : vector<128x32xf32>
    %c128_i32 = arith.constant 128 : i32
    %18 = arith.muli %arg0, %c128_i32 : i32
    %19 = tpu.iota {dimensions = array<i32: 0>} : vector<128x1xi32>
    %20 = vector.broadcast %18 : i32 to vector<128x1xi32>
    %21 = arith.addi %20, %19 : vector<128x1xi32>
    %c72_i32 = arith.constant 72 : i32
    %22 = vector.broadcast %c72_i32 : i32 to vector<128x1xi32>
    %23 = arith.cmpi slt, %21, %22 : vector<128x1xi32>
    %cst_15 = arith.constant 0.000000e+00 : f32
    %24 = vector.shape_cast %23 : vector<128x1xi1> to vector<128x1xi1>
    %25 = vector.broadcast %24 : vector<128x1xi1> to vector<128x32xi1>
    %26 = vector.broadcast %cst_15 : f32 to vector<128x32xf32>
    %27 = arith.select %25, %17, %26 : vector<128x32xi1>, vector<128x32xf32>
    %cst_16 = arith.constant dense<0.000000e+00> : vector<32xf32>
    %28 = vector.multi_reduction <add>, %27, %cst_16 [0] : vector<128x32xf32> to vector<32xf32>
    %29 = vector.shape_cast %28 : vector<32xf32> to vector<1x32xf32>
    %30 = vector.shape_cast %29 : vector<1x32xf32> to vector<1x1x32xf32>
    %c0_17 = arith.constant 0 : index
    %c0_18 = arith.constant 0 : index
    %c0_19 = arith.constant 0 : index
    %31 = vector.load %arg8[%c0_17, %c0_18, %c0_19] : memref<1x1x32xf32, #tpu.memory_space<vmem>>, vector<1x1x32xf32>
    tpu.vector_store %arg8[%c0_17, %c0_18, %c0_19], %30 {strides = array<i32>} : memref<1x1x32xf32, #tpu.memory_space<vmem>>, vector<1x1x32xf32>,
    return
  }
  func.func @transform_0(%arg0: i32) -> (i32, i32) {
    %c0_i32 = arith.constant 0 : i32
    %c0_i32_0 = arith.constant 0 : i32
    return %arg0, %c0_i32 : i32, i32
  }
  func.func @transform_1(%arg0: i32) -> (i32, i32) {
    %c0_i32 = arith.constant 0 : i32
    %c0_i32_0 = arith.constant 0 : i32
    return %arg0, %c0_i32 : i32, i32
  }
  func.func @transform_2(%arg0: i32) -> (i32, i32) {
    %c0_i32 = arith.constant 0 : i32
    %c0_i32_0 = arith.constant 0 : i32
    %c0_i32_1 = arith.constant 0 : i32
    return %c0_i32, %c0_i32_0 : i32, i32
  }
  func.func @transform_3(%arg0: i32) -> (i32, i32) {
    %c0_i32 = arith.constant 0 : i32
    %c0_i32_0 = arith.constant 0 : i32
    %c0_i32_1 = arith.constant 0 : i32
    return %c0_i32, %c0_i32_0 : i32, i32
  }
  func.func @transform_4(%arg0: i32) -> (i32, i32) {
    %c0_i32 = arith.constant 0 : i32
    %c0_i32_0 = arith.constant 0 : i32
    %c0_i32_1 = arith.constant 0 : i32
    return %c0_i32, %c0_i32_0 : i32, i32
  }
  func.func @transform_5(%arg0: i32) -> (i32, i32) {
    %c0_i32 = arith.constant 0 : i32
    %c0_i32_0 = arith.constant 0 : i32
    %c0_i32_1 = arith.constant 0 : i32
    return %c0_i32, %c0_i32_0 : i32, i32
  }
  func.func @transform_6(%arg0: i32) -> (i32, i32) {
    %c0_i32 = arith.constant 0 : i32
    %c0_i32_0 = arith.constant 0 : i32
    return %arg0, %c0_i32 : i32, i32
  }
  func.func @transform_7(%arg0: i32) -> (i32, i32, i32) {
    %c0_i32 = arith.constant 0 : i32
    %c0_i32_0 = arith.constant 0 : i32
    %c0_i32_1 = arith.constant 0 : i32
    return %arg0, %c0_i32, %c0_i32_0 : i32, i32, i32
  }
}

</mosaic_0001>

<bundles_post_ra>
// kernel: tpu_custom_call.1
= control target key start
LH: loop header
LB: loop body
LE: loop exit
PB: predicated region body
PF: predicated region fallthrough
CT: control target
= control target key end

     0   :  { %13 = vsyncpa [#allocation3], 0  ;;  %s1517_s0 = inlined_call_operand.vmem [shape: bf16[128,256], index: 0, kind: input, shape index: {}]   ;;  %s1518_s1 = inlined_call_operand.hbm [shape: bf16[128,128], index: 1, kind: input, shape index: {}]   ;;  %s1519_s2 = inlined_call_operand.hbm [shape: bf16[256,128], index: 2, kind: input, shape index: {}]   ;;  %s1520_s3 = inlined_call_operand.vmem [shape: f32[1,128], index: 3, kind: input, shape index: {}]   ;;  %s1521_s4 = inlined_call_operand.vmem [shape: f32[128,32], index: 4, kind: input, shape index: {}]   ;;  %s1522_s5 = inlined_call_operand.vmem [shape: f32[1,32], index: 5, kind: input, shape index: {}]   ;;  %s1523_s6 = inlined_call_operand.hbm [shape: bf16[128,128], index: 6, kind: output, shape index: {0}]   ;;  %s1524_s7 = inlined_call_operand.hbm [shape: f32[1,1,32], index: 7, kind: output, shape index: {1}]  }
   0x1   :  { %14 = vsyncpa [#allocation6], 0 }
   0x2   :  { %15 = vsyncpa [#allocation4], 0 }
   0x3   :  { %16 = vsyncpa [#allocation9], 0  ;;  %s1321_s24 = smov [#allocation2]  }
   0x4   :  { %s24_s25 = sshll.u32 %s1321_s24, 4  ;;  %s25_s25 = int_to_ptr.vmem [resolvable:$true] %s24_s25 }
   0x5   :  { %s1241_s26 = scalar_lea.vmem %s25_s25, 1024  ;;  %p1246_p1 = scmp.lt.s32.totalorder %s25_s25, %s25_s25 }
   0x6   :  { %p1242_p0 = scmp.ne.s32.totalorder %s25_s25, %s1241_s26  ;;  %p1247_p2 = scmp.lt.s32.totalorder %s1241_s26, %s1241_s26 }
   0x8   :  { %p1248_p3 = por %p1247_p2, %p1246_p1 }
   0xa   :  { %p1249_p4 = pnand %p1248_p3, %p1242_p0 }
   0xc   :  { %1252 = shalt.err (!%p1249_p4)
}
   0xd   :  { %s1322_s27 = smov 64   ;;  %s1323_s28 = smov 4  }
   0xe   :  { %30 = dma.hbm_to_vmem [thread:$0]  %s1518_s1, 1024, %s25_s25, [#allocation3], %s1322_s27, %s1322_s27, %s1323_s28  }
   0xf   :  { %s1324_s8 = smov [#allocation5]  }
  0x10   :  { %s36_s9 = sshll.u32 %s1324_s8, 4  ;;  %s37_s9 = int_to_ptr.vmem [resolvable:$true] %s36_s9 }
  0x11   :  { %s1261_s10 = scalar_lea.vmem %s37_s9, 2048  ;;  %p1266_p6 = scmp.lt.s32.totalorder %s37_s9, %s37_s9 }
  0x12   :  { %p1262_p5 = scmp.ne.s32.totalorder %s37_s9, %s1261_s10  ;;  %p1267_p7 = scmp.lt.s32.totalorder %s1261_s10, %s1261_s10 }
  0x14   :  { %p1268_p8 = por %p1267_p7, %p1266_p6 }
  0x16   :  { %p1269_p9 = pnand %p1268_p8, %p1262_p5 }
  0x18   :  { %1272 = shalt.err (!%p1269_p9)
}
  0x19   :  { %42 = dma.hbm_to_vmem [thread:$0]  %s1519_s2, 2048, %s37_s9, [#allocation6], %s1322_s27, %s1322_s27, %s1323_s28  }
  0x1a   :  { %1313 = dma.done.wait [#allocation3], 1024  }
  0x1b   :  { %1314 = vsyncadd [#allocation3], 4294966272 }
  0x1c   :  { %1315 = dma.done.wait [#allocation6], 2048  }
  0x1d   :  { %1316 = vsyncadd [#allocation6], 4294965248  ;;  %v1193_v0 = vld [vmem:[#allocation5 + $0x78] sm:$0xff]   ;;  %v1195_v2 = vld [vmem:[#allocation5 + $0x70] sm:$0xff]  }
  0x1e   :  { %v1194_v1 = vld [vmem:[#allocation5 + $0x38] sm:$0xff]   ;;  %1035 = vmatprep.subr.bf16.mxu0 %v1193_v0  ;;  %v1196_v3 = vld [vmem:[#allocation5 + $0x30] sm:$0xff]   ;;  %v1197_v4 = vld [vmem:[#allocation5 + $0x68] sm:$0xff]  }
  0x1f   :  { %1036 = vmatpush3.bf16.msra.mxu0 %v1194_v1  ;;  %v1198_v5 = vld [vmem:[#allocation5 + $0x28] sm:$0xff]   ;;  %v1199_v6 = vld [vmem:[#allocation5 + $0x60] sm:$0xff]   ;;  %v1201_v8 = vld [vmem:[#allocation5 + $0x58] sm:$0xff]  }
  0x20   :  { %1037 = vmatprep.subr.bf16.mxu0 %v1195_v2  ;;  %v1200_v7 = vld [vmem:[#allocation5 + $0x20] sm:$0xff]   ;;  %v1202_v9 = vld [vmem:[#allocation5 + $0x18] sm:$0xff]   ;;  %v1203_v10 = vld [vmem:[#allocation5 + $0x50] sm:$0xff]  }
  0x21   :  { %v1211_v11 = vld [vmem:[%s1517_s0 + $0x4] ss:$8 sps:$4 sm:$0xff]   ;;  %v1204_v12 = vld [vmem:[#allocation5 + $0x10] sm:$0xff]   ;;  %v543_v16 = vld [vmem:[%s1521_s4 + $0x78] sm:$0xff] }
  0x22   :  { %312 = vmatprep.mubr.bf16.mxu0 %v1211_v11  ;;  %v1205_v13 = vld [vmem:[#allocation5 + $0x48] sm:$0xff]   ;;  %v1207_v15 = vld [vmem:[#allocation5 + $0x40] sm:$0xff]   ;;  %1131 = vmatprep.subr.mxu1 %v543_v16  ;;  %v542_v18 = vld [vmem:[%s1521_s4 + $0x70] sm:$0xff] }
  0x23   :  { %1038 = vmatpush3.bf16.msra.mxu0 %v1196_v3  ;;  %v1206_v14 = vld [vmem:[#allocation5 + $0x8] sm:$0xff]   ;;  %v1208_v17 = vld [vmem:[#allocation5] sm:$0xff]   ;;  %1132 = vmatpush3.msra.mxu1 %v543_v16  ;;  %v1212_v22 = vld [vmem:[%s1517_s0 + $0x14] ss:$8 sps:$4 sm:$0xff]  }
  0x24   :  { %1039 = vmatprep.subr.bf16.mxu0 %v1197_v4  ;;  %v541_v19 = vld [vmem:[%s1521_s4 + $0x68] sm:$0xff]  ;;  %1133 = vmatprep.subr.mxu1 %v542_v18  ;;  %v540_v21 = vld [vmem:[%s1521_s4 + $0x60] sm:$0xff]  ;;  %v539_v23 = vld [vmem:[%s1521_s4 + $0x58] sm:$0xff] }
  0x25   :  { %v1209_v20 = vld [vmem:[%s1517_s0] ss:$8 sps:$4 sm:$0xff]   ;;  %1134 = vmatpush3.msra.mxu1 %v542_v18  ;;  %v538_v24 = vld [vmem:[%s1521_s4 + $0x50] sm:$0xff]  ;;  %v1215_v28 = vld [vmem:[%s1517_s0 + $0x24] ss:$8 sps:$4 sm:$0xff]  }
  0x26   :  { %1135 = vmatprep.subr.mxu1 %v541_v19  ;;  %v537_v25 = vld [vmem:[%s1521_s4 + $0x48] sm:$0xff]  ;;  %v1214_v26 = vld [vmem:[%s1517_s0 + $0x10] ss:$8 sps:$4 sm:$0xff]   ;;  %v536_v27 = vld [vmem:[%s1521_s4 + $0x40] sm:$0xff] }
  0x27   :  { %1040 = vmatpush3.bf16.msra.mxu0 %v1198_v5  ;;  %1136 = vmatpush3.msra.mxu1 %v541_v19  ;;  %v535_v29 = vld [vmem:[%s1521_s4 + $0x38] sm:$0xff]  ;;  %v534_v30 = vld [vmem:[%s1521_s4 + $0x30] sm:$0xff]  ;;  %v1217_v31 = vld [vmem:[%s1517_s0 + $0x20] ss:$8 sps:$4 sm:$0xff]  }
  0x28   :  { %1041 = vmatprep.subr.bf16.mxu0 %v1199_v6  ;;  %1137 = vmatprep.subr.mxu1 %v540_v21  ;;  %v1218_v32 = vld [vmem:[%s1517_s0 + $0x34] ss:$8 sps:$4 sm:$0xff]   ;;  %v1220_v33 = vld [vmem:[%s1517_s0 + $0x30] ss:$8 sps:$4 sm:$0xff]   ;;  %v1221_v34 = vld [vmem:[%s1517_s0 + $0x44] ss:$8 sps:$4 sm:$0xff]  }
  0x29   :  { %1138 = vmatpush3.msra.mxu1 %v540_v21  ;;  %v1223_v35 = vld [vmem:[%s1517_s0 + $0x40] ss:$8 sps:$4 sm:$0xff]   ;;  %v1224_v36 = vld [vmem:[%s1517_s0 + $0x54] ss:$8 sps:$4 sm:$0xff]   ;;  %v1226_v37 = vld [vmem:[%s1517_s0 + $0x50] ss:$8 sps:$4 sm:$0xff]  }
  0x2a   :  { %1139 = vmatprep.subr.mxu1 %v539_v23  ;;  %v1227_v38 = vld [vmem:[%s1517_s0 + $0x64] ss:$8 sps:$4 sm:$0xff]   ;;  %v1229_v39 = vld [vmem:[%s1517_s0 + $0x60] ss:$8 sps:$4 sm:$0xff]   ;;  %v1230_v40 = vld [vmem:[%s1517_s0 + $0x74] ss:$8 sps:$4 sm:$0xff]  }
  0x2b   :  { %1042 = vmatpush3.bf16.msra.mxu0 %v1200_v7  ;;  %1140 = vmatpush3.msra.mxu1 %v539_v23  ;;  %v1232_v41 = vld [vmem:[%s1517_s0 + $0x70] ss:$8 sps:$4 sm:$0xff]   ;;  %v533_v42 = vld [vmem:[%s1521_s4 + $0x28] sm:$0xff]  ;;  %v532_v43 = vld [vmem:[%s1521_s4 + $0x20] sm:$0xff] }
  0x2c   :  { %1043 = vmatprep.subr.bf16.mxu0 %v1201_v8  ;;  %1141 = vmatprep.subr.mxu1 %v538_v24  ;;  %v531_v44 = vld [vmem:[%s1521_s4 + $0x18] sm:$0xff]  ;;  %v530_v45 = vld [vmem:[%s1521_s4 + $0x10] sm:$0xff]  ;;  %v529_v46 = vld [vmem:[%s1521_s4 + $0x8] sm:$0xff] }
  0x2d   :  { %1142 = vmatpush3.msra.mxu1 %v538_v24  ;;  %v528_v47 = vld [vmem:[%s1521_s4] sm:$0xff]  ;;  %v1021_v58 = vld [vmem:[#allocation2 + $0x8] sm:$0xff]   ;;  %v1022_v8 = vld [vmem:[#allocation2 + $0x10] sm:$0xff]  }
  0x2e   :  { %1143 = vmatprep.subr.mxu1 %v537_v25  ;;  %v950_v48 = vld [vmem:[#allocation2] sm:$0xff]   ;;  %v955_v63 = vunpack.c.l.bf16 %v1021_v58  ;;  %v956_v6 = vunpack.c.h.bf16 %v1021_v58 }
  0x2f   :  { %1044 = vmatpush3.bf16.msra.mxu0 %v1202_v9  ;;  %1144 = vmatpush3.msra.mxu1 %v537_v25  ;;  %v951_v50 = vunpack.c.l.bf16 %v950_v48  ;;  %v1478_v54 = vld [vmem:[%s1520_s3] ss:$0 sm:$0xff]  ;;  %v952_v56 = vunpack.c.h.bf16 %v950_v48  ;;  %s1325_s3 = smov [#allocation7]  }
  0x30   :  { %1045 = vmatprep.subr.bf16.mxu0 %v1203_v10  ;;  %1145 = vmatprep.subr.mxu1 %v536_v27  ;;  %s856_s4 = sshll.u32 %s1325_s3, 4  ;;  %s857_s4 = int_to_ptr.vmem [resolvable:$true] %s856_s4 }
  0x31   :  { %1146 = vmatpush3.msra.mxu1 %v536_v27  ;;  %s1273_s9 = scalar_lea.vmem %s857_s4, 1024  ;;  %p1278_p11 = scmp.lt.s32.totalorder %s857_s4, %s857_s4 }
  0x32   :  { %1147 = vmatprep.subr.mxu1 %v535_v29  ;;  %p1274_p10 = scmp.ne.s32.totalorder %s857_s4, %s1273_s9  ;;  %p1279_p12 = scmp.lt.s32.totalorder %s1273_s9, %s1273_s9 }
  0x33   :  { %1046 = vmatpush3.bf16.msra.mxu0 %v1204_v12  ;;  %1148 = vmatpush3.msra.mxu1 %v535_v29 }
  0x34   :  { %1047 = vmatprep.subr.bf16.mxu0 %v1205_v13  ;;  %1149 = vmatprep.subr.mxu1 %v534_v30  ;;  %v959_v13 = vunpack.c.l.bf16 %v1022_v8  ;;  %p1280_p13 = por %p1279_p12, %p1278_p11 }
  0x35   :  { %1150 = vmatpush3.msra.mxu1 %v534_v30 }
  0x36   :  { %1151 = vmatprep.subr.mxu1 %v533_v42  ;;  %p1281_p0 = pnand %p1280_p13, %p1274_p10 }
  0x37   :  { %1048 = vmatpush3.bf16.msra.mxu0 %v1206_v14  ;;  %1152 = vmatpush3.msra.mxu1 %v533_v42 }
  0x38   :  { %1049 = vmatprep.subr.bf16.mxu0 %v1207_v15  ;;  %1153 = vmatprep.subr.mxu1 %v532_v43 }
  0x39   :  { %1154 = vmatpush3.msra.mxu1 %v532_v43 }
  0x3a   :  { %1155 = vmatprep.subr.mxu1 %v531_v44 }
  0x3b   :  { %1050 = vmatpush3.bf16.msra.mxu0 %v1208_v17  ;;  %1156 = vmatpush3.msra.mxu1 %v531_v44 }
  0x3c   :  { %1157 = vmatprep.subr.mxu1 %v530_v45 }
  0x3d   :  { %1158 = vmatpush3.msra.mxu1 %v530_v45 }
  0x3e   :  { %313 = vmatmul.mubr.bf16.vlgmr.msra.gmra.mxu0 %v1209_v20  ;;  %1159 = vmatprep.subr.mxu1 %v529_v46  ;;  %v960_v20 = vunpack.c.h.bf16 %v1022_v8 }
  0x3f   :  { %320 = vmatprep.mubr.bf16.mxu0 %v1212_v22  ;;  %1160 = vmatpush3.msra.mxu1 %v529_v46  ;;  %v1023_v22 = vld [vmem:[#allocation2 + $0x18] sm:$0xff]  }
  0x40   :  { %1161 = vmatprep.subr.mxu1 %v528_v47  ;;  %v963_v27 = vunpack.c.l.bf16 %v1023_v22 }
  0x41   :  { %1162 = vmatpush3.msra.mxu1 %v528_v47 }
  0x46   :  { %321 = vmatmul.mubr.bf16.gmra.mxu0 %v1214_v26 }
  0x47   :  { %328 = vmatprep.mubr.bf16.mxu0 %v1215_v28 }
  0x4e   :  { %329 = vmatmul.mubr.bf16.gmra.mxu0 %v1217_v31 }
  0x4f   :  { %336 = vmatprep.mubr.bf16.mxu0 %v1218_v32 }
  0x56   :  { %337 = vmatmul.mubr.bf16.gmra.mxu0 %v1220_v33 }
  0x57   :  { %344 = vmatprep.mubr.bf16.mxu0 %v1221_v34  ;;  %v964_v34 = vunpack.c.h.bf16 %v1023_v22 }
  0x5e   :  { %345 = vmatmul.mubr.bf16.gmra.mxu0 %v1223_v35 }
  0x5f   :  { %352 = vmatprep.mubr.bf16.mxu0 %v1224_v36  ;;  %v1024_v36 = vld [vmem:[#allocation2 + $0x20] sm:$0xff]  }
  0x60   :  { %v968_v48 = vunpack.c.h.bf16 %v1024_v36 }
  0x66   :  { %353 = vmatmul.mubr.bf16.gmra.mxu0 %v1226_v37 }
  0x67   :  { %360 = vmatprep.mubr.bf16.mxu0 %v1227_v38 }
  0x6e   :  { %361 = vmatmul.mubr.bf16.gmra.mxu0 %v1229_v39 }
  0x6f   :  { %368 = vmatprep.mubr.bf16.mxu0 %v1230_v40 }
  0x76   :  { %369 = vmatmul.mubr.bf16.gmra.mxu0 %v1232_v41  ;;  %v967_v41 = vunpack.c.l.bf16 %v1024_v36 }
  0xfe   :  { %v1051_v49 = vpop.f32.mrf.mxu0 }
 0x100   :  { %v1052_v51 = vpop.f32.mrf.mxu0 }
 0x101   :  { %v1053_v52 = vadd.f32 %v1052_v51, %v1051_v49 }
 0x102   :  { %v1054_v53 = vpop.f32.mrf.mxu0 }
 0x103   :  { %v409_v55 = vadd.f32 %v1053_v52, %v951_v50  ;;  %v1025_v50 = vld [vmem:[#allocation2 + $0x28] sm:$0xff]  }
 0x104   :  { %v1055_v57 = vpop.f32.mrf.mxu0 }
 0x105   :  { %v1056_v59 = vadd.f32 %v1055_v57, %v1054_v53  ;;  %v432_v60 = vadd.f32 %v1478_v54, %v409_v55 }
 0x106   :  { %v1057_v61 = vpop.f32.mrf.mxu0 }
 0x107   :  { %v410_v62 = vadd.f32 %v1056_v59, %v952_v56  ;;  %1163 = vmatprep.mubr.f32.mxu1 %v432_v60  ;;  %v971_v56 = vunpack.c.l.bf16 %v1025_v50 }
 0x108   :  { %v1058_v0 = vpop.f32.mrf.mxu0 }
 0x109   :  { %v433_v1 = vadd.f32 %v1478_v54, %v410_v62  ;;  %v1059_v2 = vadd.f32 %v1058_v0, %v1057_v61 }
 0x10a   :  { %v1060_v3 = vpop.f32.mrf.mxu0 }
 0x10b   :  { %v984_v4 = vpack.c.bf16 %v433_v1, %v432_v60  ;;  %v411_v5 = vadd.f32 %v1059_v2, %v955_v63  ;;  %1164 = vmatmul.mubr.f32.vlgmr.msra.gmra.mxu1 %v433_v1  ;;  %v972_v63 = vunpack.c.h.bf16 %v1025_v50  ;;  %v1026_v1 = vld [vmem:[#allocation2 + $0x30] sm:$0xff]  }
 0x10c   :  { %v1061_v7 = vpop.f32.mrf.mxu0 }
 0x10d   :  { %985 = vst [vmem:[#allocation7] sm:$0xff] %v984_v4   ;;  %v1062_v9 = vadd.f32 %v1061_v7, %v1060_v3  ;;  %v434_v10 = vadd.f32 %v1478_v54, %v411_v5 }
 0x10e   :  { %v1063_v11 = vpop.f32.mrf.mxu0 }
 0x10f   :  { %v412_v12 = vadd.f32 %v1062_v9, %v956_v6  ;;  %1166 = vmatprep.mubr.f32.mxu1 %v434_v10  ;;  %v975_v6 = vunpack.c.l.bf16 %v1026_v1 }
 0x110   :  { %v1064_v14 = vpop.f32.mrf.mxu0 }
 0x111   :  { %v1065_v15 = vadd.f32 %v1064_v14, %v1063_v11  ;;  %v435_v16 = vadd.f32 %v1478_v54, %v412_v12 }
 0x112   :  { %v1066_v17 = vpop.f32.mrf.mxu0 }
 0x113   :  { %v413_v18 = vadd.f32 %v1065_v15, %v959_v13  ;;  %v989_v19 = vpack.c.bf16 %v435_v16, %v434_v10  ;;  %1167 = vmatmul.mubr.f32.gmra.mxu1 %v435_v16  ;;  %v976_v13 = vunpack.c.h.bf16 %v1026_v1  ;;  %v1027_v15 = vld [vmem:[#allocation2 + $0x38] sm:$0xff]  }
 0x114   :  { %v1067_v21 = vpop.f32.mrf.mxu0 }
 0x115   :  { %1028 = vst [vmem:[#allocation7 + $0x8] sm:$0xff] %v989_v19   ;;  %v1068_v23 = vadd.f32 %v1067_v21, %v1066_v17  ;;  %v436_v24 = vadd.f32 %v1478_v54, %v413_v18 }
 0x116   :  { %v1069_v25 = vpop.f32.mrf.mxu0 }
 0x117   :  { %v414_v26 = vadd.f32 %v1068_v23, %v960_v20  ;;  %1169 = vmatprep.mubr.f32.mxu1 %v436_v24  ;;  %v979_v20 = vunpack.c.l.bf16 %v1027_v15 }
 0x118   :  { %v1070_v28 = vpop.f32.mrf.mxu0 }
 0x119   :  { %v1071_v29 = vadd.f32 %v1070_v28, %v1069_v25  ;;  %v437_v30 = vadd.f32 %v1478_v54, %v414_v26 }
 0x11a   :  { %v1072_v31 = vpop.f32.mrf.mxu0 }
 0x11b   :  { %v415_v32 = vadd.f32 %v1071_v29, %v963_v27  ;;  %v994_v33 = vpack.c.bf16 %v437_v30, %v436_v24  ;;  %1170 = vmatmul.mubr.f32.gmra.mxu1 %v437_v30  ;;  %v980_v27 = vunpack.c.h.bf16 %v1027_v15 }
 0x11c   :  { %v1073_v35 = vpop.f32.mrf.mxu0 }
 0x11d   :  { %1029 = vst [vmem:[#allocation7 + $0x10] sm:$0xff] %v994_v33   ;;  %v1074_v37 = vadd.f32 %v1073_v35, %v1072_v31  ;;  %v438_v38 = vadd.f32 %v1478_v54, %v415_v32 }
 0x11e   :  { %v1075_v39 = vpop.f32.mrf.mxu0 }
 0x11f   :  { %v416_v40 = vadd.f32 %v1074_v37, %v964_v34  ;;  %1172 = vmatprep.mubr.f32.mxu1 %v438_v38 }
 0x120   :  { %v1076_v42 = vpop.f32.mrf.mxu0 }
 0x121   :  { %v1077_v43 = vadd.f32 %v1076_v42, %v1075_v39  ;;  %v439_v44 = vadd.f32 %v1478_v54, %v416_v40 }
 0x122   :  { %v1078_v45 = vpop.f32.mrf.mxu0 }
 0x123   :  { %v417_v46 = vadd.f32 %v1077_v43, %v967_v41  ;;  %v999_v47 = vpack.c.bf16 %v439_v44, %v438_v38  ;;  %1173 = vmatmul.mubr.f32.gmra.mxu1 %v439_v44 }
 0x124   :  { %v1079_v49 = vpop.f32.mrf.mxu0 }
 0x125   :  { %1030 = vst [vmem:[#allocation7 + $0x18] sm:$0xff] %v999_v47   ;;  %v1080_v51 = vadd.f32 %v1079_v49, %v1078_v45  ;;  %v440_v52 = vadd.f32 %v1478_v54, %v417_v46 }
 0x126   :  { %v1081_v53 = vpop.f32.mrf.mxu0 }
 0x127   :  { %v418_v55 = vadd.f32 %v1080_v51, %v968_v48  ;;  %1175 = vmatprep.mubr.f32.mxu1 %v440_v52 }
 0x128   :  { %v1082_v57 = vpop.f32.mrf.mxu0 }
 0x129   :  { %v1083_v58 = vadd.f32 %v1082_v57, %v1081_v53  ;;  %v441_v59 = vadd.f32 %v1478_v54, %v418_v55 }
 0x12a   :  { %v1084_v60 = vpop.f32.mrf.mxu0 }
 0x12b   :  { %v419_v61 = vadd.f32 %v1083_v58, %v971_v56  ;;  %v1004_v62 = vpack.c.bf16 %v441_v59, %v440_v52  ;;  %1176 = vmatmul.mubr.f32.gmra.mxu1 %v441_v59 }
 0x12c   :  { %v1085_v0 = vpop.f32.mrf.mxu0 }
 0x12d   :  { %1031 = vst [vmem:[#allocation7 + $0x20] sm:$0xff] %v1004_v62   ;;  %v1086_v2 = vadd.f32 %v1085_v0, %v1084_v60  ;;  %v442_v3 = vadd.f32 %v1478_v54, %v419_v61 }
 0x12e   :  { %v1087_v4 = vpop.f32.mrf.mxu0 }
 0x12f   :  { %v420_v5 = vadd.f32 %v1086_v2, %v972_v63  ;;  %1178 = vmatprep.mubr.f32.mxu1 %v442_v3 }
 0x130   :  { %v1088_v7 = vpop.f32.mrf.mxu0 }
 0x131   :  { %v1089_v8 = vadd.f32 %v1088_v7, %v1087_v4  ;;  %v443_v9 = vadd.f32 %v1478_v54, %v420_v5 }
 0x132   :  { %v1090_v10 = vpop.f32.mrf.mxu0 }
 0x133   :  { %v421_v11 = vadd.f32 %v1089_v8, %v975_v6  ;;  %v1009_v12 = vpack.c.bf16 %v443_v9, %v442_v3  ;;  %1179 = vmatmul.mubr.f32.gmra.mxu1 %v443_v9 }
 0x134   :  { %v1091_v14 = vpop.f32.mrf.mxu0 }
 0x135   :  { %1032 = vst [vmem:[#allocation7 + $0x28] sm:$0xff] %v1009_v12   ;;  %v1092_v16 = vadd.f32 %v1091_v14, %v1090_v10  ;;  %v444_v17 = vadd.f32 %v1478_v54, %v421_v11 }
 0x136   :  { %v1093_v18 = vpop.f32.mrf.mxu0 }
 0x137   :  { %v422_v19 = vadd.f32 %v1092_v16, %v976_v13  ;;  %1181 = vmatprep.mubr.f32.mxu1 %v444_v17 }
 0x138   :  { %v1094_v21 = vpop.f32.mrf.mxu0 }
 0x139   :  { %v1095_v22 = vadd.f32 %v1094_v21, %v1093_v18  ;;  %v445_v23 = vadd.f32 %v1478_v54, %v422_v19 }
 0x13a   :  { %v1096_v24 = vpop.f32.mrf.mxu0 }
 0x13b   :  { %v423_v25 = vadd.f32 %v1095_v22, %v979_v20  ;;  %v1014_v26 = vpack.c.bf16 %v445_v23, %v444_v17  ;;  %1182 = vmatmul.mubr.f32.gmra.mxu1 %v445_v23 }
 0x13c   :  { %v1097_v28 = vpop.f32.mrf.mxu0 }
 0x13d   :  { %1033 = vst [vmem:[#allocation7 + $0x30] sm:$0xff] %v1014_v26   ;;  %v1098_v29 = vadd.f32 %v1097_v28, %v1096_v24  ;;  %v446_v30 = vadd.f32 %v1478_v54, %v423_v25 }
 0x13f   :  { %v424_v31 = vadd.f32 %v1098_v29, %v980_v27  ;;  %1184 = vmatprep.mubr.f32.mxu1 %v446_v30 }
 0x141   :  { %v447_v32 = vadd.f32 %v1478_v54, %v424_v31 }
 0x143   :  { %v1019_v33 = vpack.c.bf16 %v447_v32, %v446_v30  ;;  %1185 = vmatmul.mubr.f32.gmra.mxu1 %v447_v32 }
 0x145   :  { %1034 = vst [vmem:[#allocation7 + $0x38] sm:$0xff] %v1019_v33  }
 0x146   :  { %1284 = shalt.err (!%p1281_p0)
}
 0x147   :  { %862 = dma.vmem_to_hbm [thread:$0]  %s857_s4, 1024, %s1523_s6, [#allocation4], %s1322_s27, %s1322_s27, %s1323_s28   ;;  %vm811_vm0 = vcmask 261120   ;;  %vm849_vm1 = vcmask 253952  }
 0x148   :  { %v932_v35 = vld [vmem:[%s1522_s5] ss:$0 sm:$0xff]  ;;  %s1326_s5 = smov [#allocation8]  }
 0x149   :  { %s869_s6 = sshll.u32 %s1326_s5, 4  ;;  %s870_s6 = int_to_ptr.vmem [resolvable:$true] %s869_s6 }
 0x14a   :  { %s1293_s27 = scalar_lea.vmem %s870_s6, 16  ;;  %s1297_s28 = scalar_lea.vmem %s870_s6, 32 }
 0x14b   :  { %p1294_p1 = scmp.ne.s32.totalorder %s870_s6, %s1293_s27  ;;  %p1298_p2 = scmp.lt.s32.totalorder %s870_s6, %s870_s6 }
 0x14c   :  { %p1299_p3 = scmp.lt.s32.totalorder %s1297_s28, %s1293_s27 }
 0x14e   :  { %p1300_p4 = por %p1299_p3, %p1298_p2 }
 0x150   :  { %p1301_p5 = pnand %p1300_p4, %p1294_p1 }
 0x1cb   :  { %v1165_v54 = vpop.f32.mrf.mxu1 }
 0x1cc   :  { %v623_v39 = vadd.f32 %v1165_v54, %v932_v35 }
 0x1cd   :  { %v617_v34 = vpop.f32.mrf.mxu1 }
 0x1ce   :  { %v618_v37 = vadd.f32 %v932_v35, %v617_v34  ;;  %v697_v42 = vmax.f32 %v623_v39, 0.0 }
 0x1d0   :  { %v696_v41 = vmax.f32 %v618_v37, 0.0  ;;  %v813_v48 = vsel %vm811_vm0, %v697_v42, 0.0 }
 0x1d2   :  { %v812_v45 = vsel %vm811_vm0, %v696_v41, 0.0 }
 0x1d3   :  { %v1168_v36 = vpop.f32.mrf.mxu1  ;;  %v814_v51 = vadd.f32 %v813_v48, %v812_v45 }
 0x1d4   :  { %v633_v46 = vadd.f32 %v1168_v36, %v932_v35 }
 0x1d5   :  { %v627_v38 = vpop.f32.mrf.mxu1 }
 0x1d6   :  { %v628_v40 = vadd.f32 %v932_v35, %v627_v38  ;;  %v699_v52 = vmax.f32 %v633_v46, 0.0 }
 0x1d8   :  { %v698_v43 = vmax.f32 %v628_v40, 0.0  ;;  %v817_v58 = vsel %vm811_vm0, %v699_v52, 0.0 }
 0x1da   :  { %v815_v49 = vsel %vm811_vm0, %v698_v43, 0.0 }
 0x1db   :  { %v1171_v44 = vpop.f32.mrf.mxu1  ;;  %v816_v55 = vadd.f32 %v815_v49, %v814_v51 }
 0x1dc   :  { %v643_v56 = vadd.f32 %v1171_v44, %v932_v35 }
 0x1dd   :  { %v637_v47 = vpop.f32.mrf.mxu1  ;;  %v818_v60 = vadd.f32 %v817_v58, %v816_v55 }
 0x1de   :  { %v638_v50 = vadd.f32 %v932_v35, %v637_v47  ;;  %v701_v62 = vmax.f32 %v643_v56, 0.0 }
 0x1e0   :  { %v700_v53 = vmax.f32 %v638_v50, 0.0  ;;  %v821_v3 = vsel %vm811_vm0, %v701_v62, 0.0 }
 0x1e2   :  { %v819_v59 = vsel %vm811_vm0, %v700_v53, 0.0 }
 0x1e3   :  { %v1174_v57 = vpop.f32.mrf.mxu1  ;;  %v820_v0 = vadd.f32 %v819_v59, %v818_v60 }
 0x1e4   :  { %v653_v1 = vadd.f32 %v1174_v57, %v932_v35 }
 0x1e5   :  { %v647_v61 = vpop.f32.mrf.mxu1  ;;  %v822_v5 = vadd.f32 %v821_v3, %v820_v0 }
 0x1e6   :  { %v648_v63 = vadd.f32 %v932_v35, %v647_v61  ;;  %v703_v7 = vmax.f32 %v653_v1, 0.0 }
 0x1e8   :  { %v702_v2 = vmax.f32 %v648_v63, 0.0  ;;  %v825_v11 = vsel %vm811_vm0, %v703_v7, 0.0 }
 0x1ea   :  { %v823_v4 = vsel %vm811_vm0, %v702_v2, 0.0 }
 0x1eb   :  { %v1177_v6 = vpop.f32.mrf.mxu1  ;;  %v824_v8 = vadd.f32 %v823_v4, %v822_v5 }
 0x1ed   :  { %v657_v9 = vpop.f32.mrf.mxu1  ;;  %v826_v13 = vadd.f32 %v825_v11, %v824_v8 }
 0x1ee   :  { %v658_v10 = vadd.f32 %v932_v35, %v657_v9 }
 0x1f0   :  { %v704_v12 = vmax.f32 %v658_v10, 0.0 }
 0x1f2   :  { %v827_v14 = vsel %vm811_vm0, %v704_v12, 0.0 }
 0x1f3   :  { %v828_v15 = vadd.f32 %v827_v14, %v826_v13  ;;  %v1180_v16 = vpop.f32.mrf.mxu1 }
 0x1f5   :  { %v843_v17 = vrot.slane %v828_v15, 4  ;;  %v667_v18 = vpop.f32.mrf.mxu1 }
 0x1f7   :  { %v844_v19 = vadd.f32 %v843_v17, %v828_v15 }
 0x1f9   :  { %v845_v20 = vrot.slane %v844_v19, 2 }
 0x1fb   :  { %v846_v21 = vadd.f32 %v845_v20, %v844_v19  ;;  %v1183_v22 = vpop.f32.mrf.mxu1 }
 0x1fd   :  { %v677_v23 = vpop.f32.mrf.mxu1  ;;  %v847_v24 = vrot.slane %v846_v21, 1 }
 0x1ff   :  { %v848_v25 = vadd.f32 %v847_v24, %v846_v21 }
 0x201   :  { %850 = vst.msk [vmem:[#allocation8] sm:$0x1] %vm849_vm1, %v848_v25 }
 0x202   :  { %1304 = shalt.err (!%p1301_p5)
}
 0x203   :  { %872 = dma.vmem_to_hbm [thread:$0]  %s870_s6, 16, %s1524_s7, [#allocation9]   ;;  %v1186_v26 = vpop.f32.mrf.mxu1 }
 0x205   :  { %v687_v27 = vpop.f32.mrf.mxu1 }
 0x206   :  { %1317 = dma.done.wait [#allocation4], 1024  }
 0x207   :  { %1318 = vsyncadd [#allocation4], 4294966272 }
 0x208   :  { %1319 = dma.done.wait [#allocation9], 16  }
 0x209   :  { %1320 = vsyncadd [#allocation9], 4294967280 }
 0x20a   :  { %879 = vsyncpa [#allocation3], 1 }
 0x20b   :  { %880 = vsyncpa [#allocation6], 1 }
 0x20c   :  { %881 = vsyncpa [#allocation4], 1 }
 0x20d   :  { %882 = vsyncpa [#allocation9], 1 }

</bundles_post_ra>
